<compile_context>
chip_gen: v5e
topology: v5e:2x2
jax: 0.10.0
libtpu: 0.0.40
codegen_flags: <defaults>
</compile_context>

<pallas_src>
import jax
import jax.numpy as jnp
from jax.experimental import pallas as pl
from jax.experimental.pallas import tpu as pltpu


# ---------------------------------------------------------------------------
# Kernel
# ---------------------------------------------------------------------------

def _fma_layer(w, b, x_in, k_in):
    """acc[o, :] = b[o] + sum_k w[o, k] * x_in[k, :]  (pure VPU broadcast FMAs)."""
    acc = b                                        # (out, 1)
    for k in range(k_in):                          # unrolled at trace time
        acc = acc + w[:, k:k + 1] * x_in[k:k + 1, :]   # (out,1)*(1,B) -> (out,B)
    return acc


def actor_kernel(x_ref, p_ref, o_ref):
    x = x_ref[...]                                 # (3, TILE_B) f32, batch on lanes
    p = p_ref[...]                                 # (48, 16) packed params

    # --- unpack packed parameter slab (static slices) ---
    w1 = p[0:12, 0:3]                              # (12, 3)   [out, in]
    b1 = p[0:12, 3:4]                              # (12, 1)
    w2 = p[16:28, 0:12]                            # (12, 12)  [out, in]
    b2 = p[16:28, 12:13]                           # (12, 1)
    w3c = p[32:44, 0:1]                            # (12, 1)   column (in-major)
    b3 = p[32:33, 1:2]                             # (1, 1)

    # Layer 1: (12, B) = relu(W1 @ x + b1)   — 3 broadcast FMAs, no MXU
    h1 = jnp.maximum(_fma_layer(w1, b1, x, 3), 0.0)

    # Layer 2: (12, B) = relu(W2 @ h1 + b2)  — 12 broadcast FMAs
    h2 = jnp.maximum(_fma_layer(w2, b2, h1, 12), 0.0)

    # Layer 3: (1, B) = W3 @ h2 + b3         — elementwise mul + sublane reduce
    h3 = jnp.sum(w3c * h2, axis=0, keepdims=True) + b3

    o_ref[...] = 2.0 * jnp.tanh(h3)                # (1, TILE_B), lane-dense store


# ---------------------------------------------------------------------------
# Wrapper
# ---------------------------------------------------------------------------

def pack_params(params):
    """Pack W1,b1,W2,b2,W3,b3 (PyTorch nn.Linear layout) into one (48,16) f32 slab."""
    slab = jnp.zeros((48, 16), jnp.float32)
    slab = slab.at[0:12, 0:3].set(params["W1"])                 # (12, 3)
    slab = slab.at[0:12, 3:4].set(params["b1"][:, None])        # (12, 1)
    slab = slab.at[16:28, 0:12].set(params["W2"])               # (12, 12)
    slab = slab.at[16:28, 12:13].set(params["b2"][:, None])     # (12, 1)
    slab = slab.at[32:44, 0:1].set(params["W3"].T)              # (12, 1) column
    slab = slab.at[32:33, 1:2].set(params["b3"][None, :])       # (1, 1)
    return slab


def actor_forward(state, params, tile_b=None):
    """state: (B, 3) any float dtype; returns (B, 1) float32 = 2*tanh(MLP(state))."""
    state = jnp.asarray(state, jnp.float32)        # mirrors @to_torch .float()
    B = state.shape[0]

    # Batch tile: multiple of 128 lanes; up to 1024 for large-B throughput.
    if tile_b is None:
        tile_b = min(1024, 128 * pl.cdiv(B, 128))
    nb = pl.cdiv(B, tile_b)
    B_pad = nb * tile_b

    # Transpose to batch-on-lanes and zero-pad the batch to a tile multiple.
    x_t = state.T                                  # (3, B)
    if B_pad != B:
        x_t = jnp.pad(x_t, ((0, 0), (0, B_pad - B)))

    slab = pack_params(params)                     # (48, 16)

    out_t = pl.pallas_call(
        actor_kernel,
        out_shape=jax.ShapeDtypeStruct((1, B_pad), jnp.float32),
        grid=(nb,),
        in_specs=[
            pl.BlockSpec((3, tile_b), lambda i: (0, i)),    # activations: tiled on lanes
            pl.BlockSpec((48, 16), lambda i: (0, 0)),       # params: resident, DMA'd once
        ],
        out_specs=pl.BlockSpec((1, tile_b), lambda i: (0, i)),
        compiler_params=pltpu.CompilerParams(
            dimension_semantics=("parallel",),     # shard batch tiles across TCs (v7x)
        ),
    )(x_t, slab)

    # (1, B_pad) -> drop pad columns -> (B, 1); same row-major bytes, free reshape.
    return out_t[:, :B].reshape(B, 1)


# ---------------------------------------------------------------------------
# Params (PyTorch nn.Linear default init: U[-1/sqrt(fan_in), +1/sqrt(fan_in)])
# ---------------------------------------------------------------------------

def init_params(key):
    def linear(key, fan_in, fan_out):
        kw, kb = jax.random.split(key)
        bound = 1.0 / jnp.sqrt(jnp.float32(fan_in))
        w = jax.random.uniform(kw, (fan_out, fan_in), jnp.float32, -bound, bound)
        b = jax.random.uniform(kb, (fan_out,), jnp.float32, -bound, bound)
        return w, b

    k1, k2, k3 = jax.random.split(key, 3)
    W1, b1 = linear(k1, 3, 12)
    W2, b2 = linear(k2, 12, 12)
    W3, b3 = linear(k3, 12, 1)
    return {"W1": W1, "b1": b1, "W2": W2, "b2": b2, "W3": W3, "b3": b3}


# ---------------------------------------------------------------------------
# Demo + correctness check
# ---------------------------------------------------------------------------

if __name__ == "__main__":
    key = jax.random.PRNGKey(0)
    k_params, k_state = jax.random.split(key)

    params = init_params(k_params)
    state = jax.random.normal(k_state, (8, 3), jnp.float32)   # batch=8 pendulum states

    out = actor_forward(state, params)
    out = jax.block_until_ready(out)

    # pure-JAX reference (PyTorch convention: y = x @ W^T + b)
    ref = state
    ref = jnp.maximum(ref @ params["W1"].T + params["b1"], 0.0)
    ref = jnp.maximum(ref @ params["W2"].T + params["b2"], 0.0)
    ref = 2.0 * jnp.tanh(ref @ params["W3"].T + params["b3"])  # (8, 1)

    assert out.shape == (8, 1), f"bad shape {out.shape}"
    assert jnp.allclose(out, ref, atol=1e-5, rtol=1e-5), "mismatch vs reference"

    print("KERNEL_OK")
</pallas_src>

<mosaic_0001>
module attributes {stable_mosaic.version = 11 : i64} {
  func.func @actor_kernel(%arg0: i32, %arg1: memref<3x128xf32, #tpu.memory_space<vmem>>, %arg2: memref<48x16xf32, #tpu.memory_space<vmem>>, %arg3: memref<1x128xf32, #tpu.memory_space<vmem>>) attributes {dimension_semantics = [#tpu.dimension_semantics<parallel>], iteration_bounds = array<i64: 1>, scalar_prefetch = 0 : i64, scratch_operands = 0 : i64, tpu.core_type = #tpu.core_type<tc>, window_params = [{transform_indices = @transform_0, window_bounds = array<i64: 3, 128>}, {pipeline_mode = #tpu.pipeline_mode<synchronous>, transform_indices = @transform_1, window_bounds = array<i64: 48, 16>}, {transform_indices = @transform_2, window_bounds = array<i64: 1, 128>}]} {
    %c0 = arith.constant 0 : index
    %c0_0 = arith.constant 0 : index
    %0 = vector.load %arg1[%c0, %c0_0] : memref<3x128xf32, #tpu.memory_space<vmem>>, vector<3x128xf32>
    %c0_1 = arith.constant 0 : index
    %c0_2 = arith.constant 0 : index
    %1 = vector.load %arg2[%c0_1, %c0_2] : memref<48x16xf32, #tpu.memory_space<vmem>>, vector<48x16xf32>
    %2 = vector.extract_strided_slice %1 {offsets = [0, 0], sizes = [12, 3], strides = [1, 1]} : vector<48x16xf32> to vector<12x3xf32>
    %3 = vector.extract_strided_slice %1 {offsets = [0, 3], sizes = [12, 1], strides = [1, 1]} : vector<48x16xf32> to vector<12x1xf32>
    %4 = vector.extract_strided_slice %1 {offsets = [16, 0], sizes = [12, 12], strides = [1, 1]} : vector<48x16xf32> to vector<12x12xf32>
    %5 = vector.extract_strided_slice %1 {offsets = [16, 12], sizes = [12, 1], strides = [1, 1]} : vector<48x16xf32> to vector<12x1xf32>
    %6 = vector.extract_strided_slice %1 {offsets = [32, 0], sizes = [12, 1], strides = [1, 1]} : vector<48x16xf32> to vector<12x1xf32>
    %7 = vector.extract_strided_slice %1 {offsets = [32, 1], sizes = [1, 1], strides = [1, 1]} : vector<48x16xf32> to vector<1x1xf32>
    %8 = vector.extract_strided_slice %2 {offsets = [0, 0], sizes = [12, 1], strides = [1, 1]} : vector<12x3xf32> to vector<12x1xf32>
    %9 = vector.extract_strided_slice %0 {offsets = [0, 0], sizes = [1, 128], strides = [1, 1]} : vector<3x128xf32> to vector<1x128xf32>
    %10 = vector.broadcast %8 : vector<12x1xf32> to vector<12x128xf32>
    %11 = vector.broadcast %9 : vector<1x128xf32> to vector<12x128xf32>
    %12 = arith.mulf %10, %11 : vector<12x128xf32>
    %13 = vector.broadcast %3 : vector<12x1xf32> to vector<12x128xf32>
    %14 = arith.addf %13, %12 : vector<12x128xf32>
    %15 = vector.extract_strided_slice %2 {offsets = [0, 1], sizes = [12, 1], strides = [1, 1]} : vector<12x3xf32> to vector<12x1xf32>
    %16 = vector.extract_strided_slice %0 {offsets = [1, 0], sizes = [1, 128], strides = [1, 1]} : vector<3x128xf32> to vector<1x128xf32>
    %17 = vector.broadcast %15 : vector<12x1xf32> to vector<12x128xf32>
    %18 = vector.broadcast %16 : vector<1x128xf32> to vector<12x128xf32>
    %19 = arith.mulf %17, %18 : vector<12x128xf32>
    %20 = arith.addf %14, %19 : vector<12x128xf32>
    %21 = vector.extract_strided_slice %2 {offsets = [0, 2], sizes = [12, 1], strides = [1, 1]} : vector<12x3xf32> to vector<12x1xf32>
    %22 = vector.extract_strided_slice %0 {offsets = [2, 0], sizes = [1, 128], strides = [1, 1]} : vector<3x128xf32> to vector<1x128xf32>
    %23 = vector.broadcast %21 : vector<12x1xf32> to vector<12x128xf32>
    %24 = vector.broadcast %22 : vector<1x128xf32> to vector<12x128xf32>
    %25 = arith.mulf %23, %24 : vector<12x128xf32>
    %26 = arith.addf %20, %25 : vector<12x128xf32>
    %cst = arith.constant 0.000000e+00 : f32
    %27 = vector.broadcast %cst : f32 to vector<12x128xf32>
    %28 = arith.maximumf %26, %27 : vector<12x128xf32>
    %29 = vector.extract_strided_slice %4 {offsets = [0, 0], sizes = [12, 1], strides = [1, 1]} : vector<12x12xf32> to vector<12x1xf32>
    %30 = vector.extract_strided_slice %28 {offsets = [0, 0], sizes = [1, 128], strides = [1, 1]} : vector<12x128xf32> to vector<1x128xf32>
    %31 = vector.broadcast %29 : vector<12x1xf32> to vector<12x128xf32>
    %32 = vector.broadcast %30 : vector<1x128xf32> to vector<12x128xf32>
    %33 = arith.mulf %31, %32 : vector<12x128xf32>
    %34 = vector.broadcast %5 : vector<12x1xf32> to vector<12x128xf32>
    %35 = arith.addf %34, %33 : vector<12x128xf32>
    %36 = vector.extract_strided_slice %4 {offsets = [0, 1], sizes = [12, 1], strides = [1, 1]} : vector<12x12xf32> to vector<12x1xf32>
    %37 = vector.extract_strided_slice %28 {offsets = [1, 0], sizes = [1, 128], strides = [1, 1]} : vector<12x128xf32> to vector<1x128xf32>
    %38 = vector.broadcast %36 : vector<12x1xf32> to vector<12x128xf32>
    %39 = vector.broadcast %37 : vector<1x128xf32> to vector<12x128xf32>
    %40 = arith.mulf %38, %39 : vector<12x128xf32>
    %41 = arith.addf %35, %40 : vector<12x128xf32>
    %42 = vector.extract_strided_slice %4 {offsets = [0, 2], sizes = [12, 1], strides = [1, 1]} : vector<12x12xf32> to vector<12x1xf32>
    %43 = vector.extract_strided_slice %28 {offsets = [2, 0], sizes = [1, 128], strides = [1, 1]} : vector<12x128xf32> to vector<1x128xf32>
    %44 = vector.broadcast %42 : vector<12x1xf32> to vector<12x128xf32>
    %45 = vector.broadcast %43 : vector<1x128xf32> to vector<12x128xf32>
    %46 = arith.mulf %44, %45 : vector<12x128xf32>
    %47 = arith.addf %41, %46 : vector<12x128xf32>
    %48 = vector.extract_strided_slice %4 {offsets = [0, 3], sizes = [12, 1], strides = [1, 1]} : vector<12x12xf32> to vector<12x1xf32>
    %49 = vector.extract_strided_slice %28 {offsets = [3, 0], sizes = [1, 128], strides = [1, 1]} : vector<12x128xf32> to vector<1x128xf32>
    %50 = vector.broadcast %48 : vector<12x1xf32> to vector<12x128xf32>
    %51 = vector.broadcast %49 : vector<1x128xf32> to vector<12x128xf32>
    %52 = arith.mulf %50, %51 : vector<12x128xf32>
    %53 = arith.addf %47, %52 : vector<12x128xf32>
    %54 = vector.extract_strided_slice %4 {offsets = [0, 4], sizes = [12, 1], strides = [1, 1]} : vector<12x12xf32> to vector<12x1xf32>
    %55 = vector.extract_strided_slice %28 {offsets = [4, 0], sizes = [1, 128], strides = [1, 1]} : vector<12x128xf32> to vector<1x128xf32>
    %56 = vector.broadcast %54 : vector<12x1xf32> to vector<12x128xf32>
    %57 = vector.broadcast %55 : vector<1x128xf32> to vector<12x128xf32>
    %58 = arith.mulf %56, %57 : vector<12x128xf32>
    %59 = arith.addf %53, %58 : vector<12x128xf32>
    %60 = vector.extract_strided_slice %4 {offsets = [0, 5], sizes = [12, 1], strides = [1, 1]} : vector<12x12xf32> to vector<12x1xf32>
    %61 = vector.extract_strided_slice %28 {offsets = [5, 0], sizes = [1, 128], strides = [1, 1]} : vector<12x128xf32> to vector<1x128xf32>
    %62 = vector.broadcast %60 : vector<12x1xf32> to vector<12x128xf32>
    %63 = vector.broadcast %61 : vector<1x128xf32> to vector<12x128xf32>
    %64 = arith.mulf %62, %63 : vector<12x128xf32>
    %65 = arith.addf %59, %64 : vector<12x128xf32>
    %66 = vector.extract_strided_slice %4 {offsets = [0, 6], sizes = [12, 1], strides = [1, 1]} : vector<12x12xf32> to vector<12x1xf32>
    %67 = vector.extract_strided_slice %28 {offsets = [6, 0], sizes = [1, 128], strides = [1, 1]} : vector<12x128xf32> to vector<1x128xf32>
    %68 = vector.broadcast %66 : vector<12x1xf32> to vector<12x128xf32>
    %69 = vector.broadcast %67 : vector<1x128xf32> to vector<12x128xf32>
    %70 = arith.mulf %68, %69 : vector<12x128xf32>
    %71 = arith.addf %65, %70 : vector<12x128xf32>
    %72 = vector.extract_strided_slice %4 {offsets = [0, 7], sizes = [12, 1], strides = [1, 1]} : vector<12x12xf32> to vector<12x1xf32>
    %73 = vector.extract_strided_slice %28 {offsets = [7, 0], sizes = [1, 128], strides = [1, 1]} : vector<12x128xf32> to vector<1x128xf32>
    %74 = vector.broadcast %72 : vector<12x1xf32> to vector<12x128xf32>
    %75 = vector.broadcast %73 : vector<1x128xf32> to vector<12x128xf32>
    %76 = arith.mulf %74, %75 : vector<12x128xf32>
    %77 = arith.addf %71, %76 : vector<12x128xf32>
    %78 = vector.extract_strided_slice %4 {offsets = [0, 8], sizes = [12, 1], strides = [1, 1]} : vector<12x12xf32> to vector<12x1xf32>
    %79 = vector.extract_strided_slice %28 {offsets = [8, 0], sizes = [1, 128], strides = [1, 1]} : vector<12x128xf32> to vector<1x128xf32>
    %80 = vector.broadcast %78 : vector<12x1xf32> to vector<12x128xf32>
    %81 = vector.broadcast %79 : vector<1x128xf32> to vector<12x128xf32>
    %82 = arith.mulf %80, %81 : vector<12x128xf32>
    %83 = arith.addf %77, %82 : vector<12x128xf32>
    %84 = vector.extract_strided_slice %4 {offsets = [0, 9], sizes = [12, 1], strides = [1, 1]} : vector<12x12xf32> to vector<12x1xf32>
    %85 = vector.extract_strided_slice %28 {offsets = [9, 0], sizes = [1, 128], strides = [1, 1]} : vector<12x128xf32> to vector<1x128xf32>
    %86 = vector.broadcast %84 : vector<12x1xf32> to vector<12x128xf32>
    %87 = vector.broadcast %85 : vector<1x128xf32> to vector<12x128xf32>
    %88 = arith.mulf %86, %87 : vector<12x128xf32>
    %89 = arith.addf %83, %88 : vector<12x128xf32>
    %90 = vector.extract_strided_slice %4 {offsets = [0, 10], sizes = [12, 1], strides = [1, 1]} : vector<12x12xf32> to vector<12x1xf32>
    %91 = vector.extract_strided_slice %28 {offsets = [10, 0], sizes = [1, 128], strides = [1, 1]} : vector<12x128xf32> to vector<1x128xf32>
    %92 = vector.broadcast %90 : vector<12x1xf32> to vector<12x128xf32>
    %93 = vector.broadcast %91 : vector<1x128xf32> to vector<12x128xf32>
    %94 = arith.mulf %92, %93 : vector<12x128xf32>
    %95 = arith.addf %89, %94 : vector<12x128xf32>
    %96 = vector.extract_strided_slice %4 {offsets = [0, 11], sizes = [12, 1], strides = [1, 1]} : vector<12x12xf32> to vector<12x1xf32>
    %97 = vector.extract_strided_slice %28 {offsets = [11, 0], sizes = [1, 128], strides = [1, 1]} : vector<12x128xf32> to vector<1x128xf32>
    %98 = vector.broadcast %96 : vector<12x1xf32> to vector<12x128xf32>
    %99 = vector.broadcast %97 : vector<1x128xf32> to vector<12x128xf32>
    %100 = arith.mulf %98, %99 : vector<12x128xf32>
    %101 = arith.addf %95, %100 : vector<12x128xf32>
    %cst_3 = arith.constant 0.000000e+00 : f32
    %102 = vector.broadcast %cst_3 : f32 to vector<12x128xf32>
    %103 = arith.maximumf %101, %102 : vector<12x128xf32>
    %104 = vector.broadcast %6 : vector<12x1xf32> to vector<12x128xf32>
    %105 = arith.mulf %104, %103 : vector<12x128xf32>
    %cst_4 = arith.constant dense<0.000000e+00> : vector<128xf32>
    %106 = vector.multi_reduction <add>, %105, %cst_4 [0] : vector<12x128xf32> to vector<128xf32>
    %107 = vector.shape_cast %106 : vector<128xf32> to vector<1x128xf32>
    %108 = vector.broadcast %7 : vector<1x1xf32> to vector<1x128xf32>
    %109 = arith.addf %107, %108 : vector<1x128xf32>
    %110 = math.tanh %109 : vector<1x128xf32>
    %cst_5 = arith.constant 2.000000e+00 : f32
    %111 = vector.broadcast %cst_5 : f32 to vector<1x128xf32>
    %112 = arith.mulf %111, %110 : vector<1x128xf32>
    %c0_6 = arith.constant 0 : index
    %c0_7 = arith.constant 0 : index
    %113 = vector.load %arg3[%c0_6, %c0_7] : memref<1x128xf32, #tpu.memory_space<vmem>>, vector<1x128xf32>
    tpu.vector_store %arg3[%c0_6, %c0_7], %112 {strides = array<i32>} : memref<1x128xf32, #tpu.memory_space<vmem>>, vector<1x128xf32>,
    return
  }
  func.func @transform_0(%arg0: i32) -> (i32, i32) {
    %c0_i32 = arith.constant 0 : i32
    %c0_i32_0 = arith.constant 0 : i32
    return %c0_i32, %arg0 : i32, i32
  }
  func.func @transform_1(%arg0: i32) -> (i32, i32) {
    %c0_i32 = arith.constant 0 : i32
    %c0_i32_0 = arith.constant 0 : i32
    %c0_i32_1 = arith.constant 0 : i32
    return %c0_i32, %c0_i32_0 : i32, i32
  }
  func.func @transform_2(%arg0: i32) -> (i32, i32) {
    %c0_i32 = arith.constant 0 : i32
    %c0_i32_0 = arith.constant 0 : i32
    return %c0_i32, %arg0 : i32, i32
  }
}

</mosaic_0001>

<bundles_post_ra>
// kernel: tpu_custom_call.1
= control target key start
LH: loop header
LB: loop body
LE: loop exit
PB: predicated region body
PF: predicated region fallthrough
CT: control target
= control target key end

     0   :  { %v359_v1 = vmov 1   ;;  %v360_v2 = vmov 3   ;;  %s447_s0 = inlined_call_operand.vmem [shape: f32[3,128], index: 0, kind: input, shape index: {}]   ;;  %s448_s1 = inlined_call_operand.vmem [shape: f32[48,16], index: 1, kind: input, shape index: {}]   ;;  %s449_s2 = inlined_call_operand.hbm [shape: f32[1,128], index: 2, kind: output, shape index: {}]  }
   0x1   :  { %v13_v0 = vld [vmem:[%s448_s1] sm:$0xff]  ;;  %299 = vset.pattern.permute.xlu2 %v359_v1  ;;  %298 = vset.pattern.permute.xlu1 %v360_v2 }
   0x2   :  { %7 = vsyncpa [#allocation3], 0  ;;  %v361_v3 = vmov 0   ;;  %43 = vperm.xlu2 %299, %v13_v0   ;;  %33 = vperm.xlu1 %298, %v13_v0   ;;  %v14_v4 = vld [vmem:[%s448_s1 + $0x8] sm:$0xff]  ;;  %v398_v5 = vld [vmem:[%s448_s1 + $0x10] sm:$0xff]  ;;  %v362_v6 = vmov 2  }
   0x3   :  { %297 = vset.pattern.permute.xlu0 %v361_v3  ;;  %v405_v7 = vld [vmem:[%s448_s1 + $0x18] sm:$0xff]  ;;  %v363_v8 = vmov 12   ;;  %v364_v9 = vmov 5   ;;  %v365_v10 = vmov 4   ;;  %v366_v11 = vmov 8   ;;  %v17_v18 = vld [vmem:[%s448_s1 + $0x20] sm:$0xff] }
   0x4   :  { %21 = vperm.xlu0 %297, %v13_v0   ;;  %v367_v12 = vmov 10   ;;  %v368_v13 = vmov 6   ;;  %v369_v14 = vmov 7   ;;  %v370_v15 = vmov 9   ;;  %v12_v19 = vld [vmem:[%s447_s0] sm:$0x7] }
   0x5   :  { %v371_v20 = vmov 11   ;;  %v50_v21 = vperm.slane %v12_v19, 1  ;;  %v29_v23 = vperm.slane %v12_v19, 0  ;;  %v18_v28 = vld [vmem:[%s448_s1 + $0x28] sm:$0xff]  ;;  %v63_v38 = vperm.slane %v12_v19, 2  ;;  %s372_s0 = smov [#allocation2]  }
   0x6   :  { %vm250_vm0 = vcmask 1043456   ;;  %s272_s1 = sshll.u32 %s372_s0, 4  ;;  %s274_s25 = sshll.u32 %s449_s2, 4  ;;  %s273_s1 = int_to_ptr.vmem [resolvable:$true] %s272_s1  ;;  %s275_s25 = int_to_ptr.hbm [resolvable:$true] %s274_s25 }
   0xa   :  { %47 = vperm.xlu2 %299, %v14_v4   ;;  %37 = vperm.xlu1 %298, %v14_v4  }
   0xc   :  { %26 = vperm.xlu0 %297, %v14_v4  }
  0x12   :  { %302 = vset.pattern.permute.xlu2 %v361_v3  ;;  %301 = vset.pattern.permute.xlu1 %v362_v6 }
  0x13   :  { %72 = vperm.xlu2 %302, %v398_v5   ;;  %60 = vperm.xlu1 %301, %v14_v4  }
  0x14   :  { %300 = vset.pattern.permute.xlu0 %v362_v6 }
  0x15   :  { %56 = vperm.xlu0 %300, %v13_v0  }
  0x1b   :  { %304 = vset.pattern.permute.xlu2 %v363_v8  ;;  %303 = vset.pattern.permute.xlu1 %v361_v3 }
  0x1c   :  { %84 = vperm.xlu2 %304, %v398_v5   ;;  %77 = vperm.xlu1 %303, %v405_v7  }
  0x1d   :  { %305 = vset.pattern.permute.xlu0 %v363_v8 }
  0x1e   :  { %88 = vperm.xlu0 %305, %v405_v7  }
  0x24   :  { %307 = vset.pattern.permute.xlu2 %v359_v1  ;;  %306 = vset.pattern.permute.xlu1 %v359_v1 }
  0x25   :  { %98 = vperm.xlu2 %307, %v405_v7   ;;  %94 = vperm.xlu1 %306, %v398_v5  }
  0x26   :  { %310 = vset.pattern.permute.xlu0 %v360_v2 }
  0x27   :  { %120 = vperm.xlu0 %310, %v398_v5  }
  0x2d   :  { %309 = vset.pattern.permute.xlu2 %v362_v6  ;;  %308 = vset.pattern.permute.xlu1 %v362_v6 }
  0x2e   :  { %111 = vperm.xlu2 %309, %v405_v7   ;;  %107 = vperm.xlu1 %308, %v398_v5  }
  0x2f   :  { %315 = vset.pattern.permute.xlu0 %v364_v9 }
  0x30   :  { %150 = vperm.xlu0 %315, %v405_v7  }
  0x36   :  { %312 = vset.pattern.permute.xlu2 %v365_v10  ;;  %311 = vset.pattern.permute.xlu1 %v360_v2 }
  0x37   :  { %133 = vperm.xlu2 %312, %v398_v5   ;;  %124 = vperm.xlu1 %311, %v405_v7  }
  0x38   :  { %320 = vset.pattern.permute.xlu0 %v366_v11 }
  0x39   :  { %189 = vperm.xlu0 %320, %v405_v7  }
  0x3f   :  { %314 = vset.pattern.permute.xlu2 %v364_v9  ;;  %313 = vset.pattern.permute.xlu1 %v365_v10 }
  0x40   :  { %146 = vperm.xlu2 %314, %v398_v5   ;;  %137 = vperm.xlu1 %313, %v405_v7  }
  0x41   :  { %325 = vset.pattern.permute.xlu0 %v367_v12 }
  0x42   :  { %211 = vperm.xlu0 %325, %v398_v5  }
  0x48   :  { %317 = vset.pattern.permute.xlu2 %v368_v13  ;;  %316 = vset.pattern.permute.xlu1 %v368_v13 }
  0x49   :  { %163 = vperm.xlu2 %317, %v405_v7   ;;  %159 = vperm.xlu1 %316, %v398_v5  }
  0x4a   :  { %330 = vset.pattern.permute.xlu0 %v359_v1 }
  0x4b   :  { %260 = vperm.xlu0 %330, %v17_v18  }
  0x51   :  { %319 = vset.pattern.permute.xlu2 %v369_v14  ;;  %318 = vset.pattern.permute.xlu1 %v369_v14 }
  0x52   :  { %172 = vperm.xlu2 %319, %v398_v5   ;;  %176 = vperm.xlu1 %318, %v405_v7  }
  0x5a   :  { %322 = vset.pattern.permute.xlu2 %v370_v15  ;;  %321 = vset.pattern.permute.xlu1 %v366_v11 }
  0x5b   :  { %202 = vperm.xlu2 %322, %v405_v7   ;;  %185 = vperm.xlu1 %321, %v398_v5  }
  0x5c   :  { %v44_v16 = vpop.permute.xlu2 %43 }
  0x5d   :  { %v51_v26 = vmul.f32 %v50_v21, %v44_v16 }
  0x63   :  { %324 = vset.pattern.permute.xlu2 %v367_v12  ;;  %323 = vset.pattern.permute.xlu1 %v370_v15 }
  0x64   :  { %215 = vperm.xlu2 %324, %v405_v7   ;;  %198 = vperm.xlu1 %323, %v398_v5   ;;  %v48_v17 = vpop.permute.xlu2 %47 }
  0x65   :  { %v52_v35 = vmul.f32 %v50_v21, %v48_v17 }
  0x6c   :  { %327 = vset.pattern.permute.xlu2 %v371_v20  ;;  %326 = vset.pattern.permute.xlu1 %v371_v20 }
  0x6d   :  { %224 = vperm.xlu2 %327, %v398_v5   ;;  %228 = vperm.xlu1 %326, %v405_v7   ;;  %v73_v22 = vpop.permute.xlu2 %72 }
  0x74   :  { %v34_v24 = vpop.permute.xlu1 %33 }
  0x75   :  { %329 = vset.pattern.permute.xlu2 %v361_v3  ;;  %328 = vset.pattern.permute.xlu1 %v361_v3 }
  0x76   :  { %v22_v25 = vpop.permute.xlu0 %21  ;;  %240 = vperm.xlu2 %329, %v17_v18   ;;  %245 = vperm.xlu1 %328, %v18_v28   ;;  %v85_v31 = vpop.permute.xlu2 %84 }
  0x77   :  { %v30_v27 = vmul.f32 %v29_v23, %v22_v25 }
  0x79   :  { %v40_v29 = vadd.f32 %v34_v24, %v30_v27 }
  0x7b   :  { %v53_v30 = vadd.f32 %v51_v26, %v40_v29 }
  0x7c   :  { %v38_v32 = vpop.permute.xlu1 %37 }
  0x7e   :  { %v27_v33 = vpop.permute.xlu0 %26 }
  0x7f   :  { %v31_v34 = vmul.f32 %v29_v23, %v27_v33  ;;  %v99_v39 = vpop.permute.xlu2 %98 }
  0x81   :  { %v41_v36 = vadd.f32 %v38_v32, %v31_v34 }
  0x83   :  { %v54_v37 = vadd.f32 %v52_v35, %v41_v36 }
  0x85   :  { %v61_v40 = vpop.permute.xlu1 %60 }
  0x86   :  { %v65_v41 = vmul.f32 %v63_v38, %v61_v40 }
  0x87   :  { %v57_v47 = vpop.permute.xlu0 %56 }
  0x88   :  { %v67_v42 = vadd.f32 %v65_v41, %v54_v37  ;;  %v112_v43 = vpop.permute.xlu2 %111  ;;  %v64_v48 = vmul.f32 %v63_v38, %v57_v47 }
  0x8a   :  { %v66_v51 = vadd.f32 %v64_v48, %v53_v30  ;;  %v69_v23 = vmax.f32 %v67_v42, 0.0 }
  0x8c   :  { %v68_v52 = vmax.f32 %v66_v51, 0.0  ;;  %v192_v32 = vperm.slane %v69_v23, 0  ;;  %v205_v38 = vperm.slane %v69_v23, 1 }
  0x8e   :  { %v78_v44 = vpop.permute.xlu1 %77  ;;  %v80_v55 = vperm.slane %v68_v52, 0  ;;  %v101_v58 = vperm.slane %v68_v52, 1  ;;  %v114_v62 = vperm.slane %v68_v52, 2  ;;  %v127_v3 = vperm.slane %v68_v52, 3 }
  0x8f   :  { %v140_v6 = vperm.slane %v68_v52, 4  ;;  %v153_v17 = vperm.slane %v68_v52, 5  ;;  %v166_v24 = vperm.slane %v68_v52, 6  ;;  %v179_v28 = vperm.slane %v68_v52, 7 }
  0x90   :  { %v89_v53 = vpop.permute.xlu0 %88  ;;  %v82_v57 = vmul.f32 %v80_v55, %v78_v44  ;;  %v103_v63 = vmul.f32 %v101_v58, %v99_v39  ;;  %v81_v0 = vmul.f32 %v80_v55, %v73_v22  ;;  %v116_v5 = vmul.f32 %v114_v62, %v112_v43 }
  0x91   :  { %v134_v46 = vpop.permute.xlu2 %133  ;;  %v218_v43 = vperm.slane %v69_v23, 2 }
  0x92   :  { %v92_v60 = vadd.f32 %v89_v53, %v82_v57  ;;  %v91_v8 = vadd.f32 %v85_v31, %v81_v0  ;;  %v141_v26 = vmul.f32 %v140_v6, %v134_v46 }
  0x94   :  { %v105_v2 = vadd.f32 %v103_v63, %v92_v60 }
  0x96   :  { %v118_v10 = vadd.f32 %v116_v5, %v105_v2 }
  0x97   :  { %v95_v45 = vpop.permute.xlu1 %94 }
  0x98   :  { %v102_v4 = vmul.f32 %v101_v58, %v95_v45 }
  0x99   :  { %v121_v59 = vpop.permute.xlu0 %120 }
  0x9a   :  { %v147_v50 = vpop.permute.xlu2 %146  ;;  %v104_v12 = vadd.f32 %v102_v4, %v91_v8  ;;  %v128_v19 = vmul.f32 %v127_v3, %v121_v59  ;;  %v231_v59 = vperm.slane %v69_v23, 3 }
  0x9b   :  { %v154_v35 = vmul.f32 %v153_v17, %v147_v50 }
  0xa0   :  { %v108_v49 = vpop.permute.xlu1 %107 }
  0xa1   :  { %v115_v9 = vmul.f32 %v114_v62, %v108_v49 }
  0xa2   :  { %v151_v13 = vpop.permute.xlu0 %150 }
  0xa3   :  { %v164_v56 = vpop.permute.xlu2 %163  ;;  %v117_v16 = vadd.f32 %v115_v9, %v104_v12  ;;  %v155_v21 = vmul.f32 %v153_v17, %v151_v13 }
  0xa4   :  { %v168_v27 = vmul.f32 %v166_v24, %v164_v56 }
  0xa5   :  { %v130_v22 = vadd.f32 %v128_v19, %v117_v16 }
  0xa7   :  { %v143_v30 = vadd.f32 %v141_v26, %v130_v22 }
  0xa9   :  { %v125_v54 = vpop.permute.xlu1 %124  ;;  %v156_v40 = vadd.f32 %v154_v35, %v143_v30 }
  0xaa   :  { %v129_v7 = vmul.f32 %v127_v3, %v125_v54 }
  0xab   :  { %v190_v29 = vpop.permute.xlu0 %189 }
  0xac   :  { %v173_v1 = vpop.permute.xlu2 %172  ;;  %v131_v14 = vadd.f32 %v129_v7, %v118_v10  ;;  %v194_v37 = vmul.f32 %v192_v32, %v190_v29 }
  0xad   :  { %v180_v48 = vmul.f32 %v179_v28, %v173_v1 }
  0xb2   :  { %v138_v61 = vpop.permute.xlu1 %137 }
  0xb3   :  { %v142_v11 = vmul.f32 %v140_v6, %v138_v61 }
  0xb4   :  { %v212_v55 = vpop.permute.xlu0 %211 }
  0xb5   :  { %v144_v18 = vadd.f32 %v142_v11, %v131_v14  ;;  %v203_v20 = vpop.permute.xlu2 %202  ;;  %v219_v58 = vmul.f32 %v218_v43, %v212_v55 }
  0xb6   :  { %v207_v42 = vmul.f32 %v205_v38, %v203_v20 }
  0xb7   :  { %v157_v25 = vadd.f32 %v155_v21, %v144_v18 }
  0xb9   :  { %v170_v33 = vadd.f32 %v168_v27, %v157_v25 }
  0xbb   :  { %v160_v15 = vpop.permute.xlu1 %159 }
  0xbc   :  { %v167_v36 = vmul.f32 %v166_v24, %v160_v15 }
  0xbd   :  { %v261_v16 = vpop.permute.xlu0 %260 }
  0xbe   :  { %v216_v41 = vpop.permute.xlu2 %215  ;;  %v169_v45 = vadd.f32 %v167_v36, %v156_v40 }
  0xbf   :  { %v220_v46 = vmul.f32 %v218_v43, %v216_v41 }
  0xc0   :  { %v182_v52 = vadd.f32 %v180_v48, %v169_v45 }
  0xc4   :  { %v177_v31 = vpop.permute.xlu1 %176 }
  0xc5   :  { %v181_v34 = vmul.f32 %v179_v28, %v177_v31 }
  0xc7   :  { %v183_v39 = vadd.f32 %v181_v34, %v170_v33  ;;  %v225_v57 = vpop.permute.xlu2 %224 }
  0xc8   :  { %v232_v61 = vmul.f32 %v231_v59, %v225_v57 }
  0xc9   :  { %v196_v44 = vadd.f32 %v194_v37, %v183_v39 }
  0xcb   :  { %v209_v47 = vadd.f32 %v207_v42, %v196_v44 }
  0xcd   :  { %v186_v49 = vpop.permute.xlu1 %185  ;;  %v222_v51 = vadd.f32 %v220_v46, %v209_v47 }
  0xce   :  { %v193_v53 = vmul.f32 %v192_v32, %v186_v49 }
  0xd0   :  { %v195_v54 = vadd.f32 %v193_v53, %v182_v52  ;;  %v241_v1 = vpop.permute.xlu2 %240 }
  0xd6   :  { %v199_v50 = vpop.permute.xlu1 %198 }
  0xd7   :  { %v206_v56 = vmul.f32 %v205_v38, %v199_v50 }
  0xd9   :  { %v208_v60 = vadd.f32 %v206_v56, %v195_v54 }
  0xdb   :  { %v221_v62 = vadd.f32 %v219_v58, %v208_v60 }
  0xdd   :  { %v234_v63 = vadd.f32 %v232_v61, %v221_v62 }
  0xdf   :  { %v229_v0 = vpop.permute.xlu1 %228  ;;  %v236_v4 = vmax.f32 %v234_v63, 0.0 }
  0xe0   :  { %v233_v2 = vmul.f32 %v231_v59, %v229_v0 }
  0xe1   :  { %v248_v8 = vmul.f32 %v241_v1, %v236_v4 }
  0xe2   :  { %v235_v3 = vadd.f32 %v233_v2, %v222_v51 }
  0xe4   :  { %v237_v5 = vmax.f32 %v235_v3, 0.0 }
  0xe8   :  { %v246_v6 = vpop.permute.xlu1 %245 }
  0xe9   :  { %v249_v7 = vmul.f32 %v246_v6, %v237_v5 }
  0xeb   :  { %v251_v9 = vsel %vm250_vm0, %v249_v7, 0.0 }
  0xec   :  { %v252_v10 = vadd.f32 %v251_v9, %v248_v8 }
  0xee   :  { %v253_v11 = vrot.slane %v252_v10, 4 }
  0xf0   :  { %v254_v12 = vadd.f32 %v253_v11, %v252_v10 }
  0xf2   :  { %v255_v13 = vrot.slane %v254_v12, 2 }
  0xf4   :  { %v256_v14 = vadd.f32 %v255_v13, %v254_v12 }
  0xf6   :  { %v257_v15 = vrot.slane %v256_v14, 1 }
  0xf8   :  { %v258_v17 = vadd.f32 %v257_v15, %v256_v14 }
  0xfa   :  { %v263_v18 = vadd.f32 %v261_v16, %v258_v17 }
  0xfc   :  { %331 = vtanh.f32 %v263_v18 }
 0x102   :  { %v332_v19 = vpop.eup %331 }
 0x103   :  { %v265_v20 = vmul.f32 2.0, %v332_v19 }
 0x105   :  { %266 = vst [vmem:[#allocation2] sm:$0x1] %v265_v20 }
 0x106   :  { %277 = dma.vmem_to_hbm [thread:$0]  %s273_s1, 16, %s275_s25, [#allocation3]  }
 0x107   :  { %357 = dma.done.wait [#allocation3], 16  }
 0x108   :  { %358 = vsyncadd [#allocation3], 4294967280 }
 0x109   :  { %282 = vsyncpa [#allocation3], 1 }

</bundles_post_ra>
